<compile_context>
chip_gen: v6e
topology: v6e:2x2x1
jax: 0.10.0
libtpu: 0.0.40
codegen_flags: <defaults>
</compile_context>

<pallas_src>
import functools

import jax
import jax.numpy as jnp
from jax import lax
from jax.experimental import pallas as pl
from jax.experimental.pallas import tpu as pltpu


# ----------------------------- Pallas kernels ------------------------------

def _stage12_kernel(x_ref, w_ref, o_ref, *scratch, k_taps, dil, stride, pad):
    """Fused [1x1 in_c->rank] + [depthwise (k_y,1)] on one (H, TW, Cin) block.

    x_ref : (H, TW, Cin)   input tile (full H, channels-last)
    w_ref : (Ky, Cin, R)   folded weights  w1 * wy[k]
    o_ref : (Ho, TW, R)    rank activation tile
    scratch (optional): (H + 2*pad, TW, Cin) VMEM pad buffer (only if pad > 0)
    """
    h, tw, cin = x_ref.shape
    ho, _, r = o_ref.shape

    if pad > 0:
        s_ref = scratch[0]
        s_ref[...] = jnp.zeros_like(s_ref)          # zero pad rows (cheap, VMEM)
        s_ref[pl.ds(pad, h), :, :] = x_ref[...]
        src = s_ref
    else:
        src = x_ref

    acc = jnp.zeros((ho * tw, r), jnp.float32)
    for k in range(k_taps):                          # static unrolled tap loop
        if stride == 1:
            xk = src[pl.ds(k * dil, ho), :, :]       # (Ho, TW, Cin)
        else:
            xk = src[pl.ds(k * dil, ho, stride), :, :]
        acc = acc + jnp.dot(xk.reshape(ho * tw, cin), w_ref[k, :, :],
                            preferred_element_type=jnp.float32)
    o_ref[...] = acc.reshape(ho, tw, r).astype(o_ref.dtype)


def _stage34_kernel(z_ref, w_ref, b_ref, o_ref, *scratch,
                    k_taps, dil, stride, pad):
    """Fused [depthwise (1,k_x)] + [1x1 rank->out_c + bias] on one block.

    z_ref : (THo, W, R)     rank activation tile (full W)
    w_ref : (Kx, R, Cout)   folded weights  wx[k] * w4
    b_ref : (1, Cout)       bias
    o_ref : (THo, Wo, Cout)
    scratch (optional): (THo, W + 2*pad, R) VMEM pad buffer (only if pad > 0)
    """
    tho, w, r = z_ref.shape
    _, wo, cout = o_ref.shape

    if pad > 0:
        s_ref = scratch[0]
        s_ref[...] = jnp.zeros_like(s_ref)
        s_ref[:, pl.ds(pad, w), :] = z_ref[...]
        src = s_ref
    else:
        src = z_ref

    acc = jnp.zeros((tho * wo, cout), jnp.float32)
    for k in range(k_taps):
        if stride == 1:
            zk = src[:, pl.ds(k * dil, wo), :]       # (THo, Wo, R)
        else:
            zk = src[:, pl.ds(k * dil, wo, stride), :]
        acc = acc + jnp.dot(zk.reshape(tho * wo, r), w_ref[k, :, :],
                            preferred_element_type=jnp.float32)
    acc = acc + b_ref[...].astype(jnp.float32)
    o_ref[...] = acc.reshape(tho, wo, cout).astype(o_ref.dtype)


# ------------------------------ tiling helper -------------------------------

def _pick_tile(dim, unit_bytes, budget=2 * 1024 * 1024):
    """Largest tile that keeps ~`budget` bytes per block, divides `dim`, and
    is a multiple of 8 (or the full dim) so the (8,128) tiling rule holds."""
    limit = max(1, budget // max(int(unit_bytes), 1))
    if dim <= limit:
        return dim
    cands = [t for t in range(8, limit + 1, 8) if dim % t == 0]
    if cands:
        return max(cands)
    # TODO(synk): no well-shaped divisor; fall back to the full dim (may
    # exceed the per-block VMEM budget for very large awkward shapes).
    return dim


# ------------------------------ forward wrapper ------------------------------

def cp_conv2d_forward(x_nchw, params, cfg):
    """CPConv2d.forward.  x: NCHW (PyTorch convention), returns NCHW."""
    w1, wy, wx, w4, bias = params   # (Cin,R), (Ky,R), (Kx,R), (R,Cout), (Cout,)
    pad_y, pad_x = cfg["padding"]
    sy, sx = cfg["stride"]
    dy, dx = cfg["dilation"]
    n, cin, h, w = x_nchw.shape
    k_y, r = wy.shape[0], w1.shape[1]
    k_x, cout = wx.shape[0], w4.shape[1]
    dtype = x_nchw.dtype
    isz = x_nchw.dtype.itemsize

    hp = h + 2 * pad_y
    wp = w + 2 * pad_x
    ho = (hp - dy * (k_y - 1) - 1) // sy + 1
    wo = (wp - dx * (k_x - 1) - 1) // sx + 1

    # Fold the depthwise taps into the 1x1 weights -> everything runs on MXU.
    wfa = (w1[None, :, :] * wy[:, None, :]).astype(dtype)    # (Ky, Cin, R)
    wfb = (wx[:, :, None] * w4[None, :, :]).astype(dtype)    # (Kx, R, Cout)
    if bias is None:
        bias = jnp.zeros((cout,), dtype)
    b2 = bias.reshape(1, cout).astype(dtype)

    # NCHW -> NHWC layout glue (channels-last keeps matmul rows lane-friendly).
    # TODO(synk): fold these boundary transposes into the kernels' index maps.
    x = jnp.transpose(x_nchw, (0, 2, 3, 1))                  # (N, H, W, Cin)

    cparams = pltpu.CompilerParams(
        dimension_semantics=("parallel", "parallel"),
        vmem_limit_bytes=32 * 1024 * 1024)

    # ---- kernel A: fused [1x1 in->rank] + [depthwise (k_y, 1)] -------------
    tw = _pick_tile(w, (hp * cin + ho * r) * isz * 2)
    ka = functools.partial(_stage12_kernel,
                           k_taps=k_y, dil=dy, stride=sy, pad=pad_y)
    scratch_a = [pltpu.VMEM((hp, tw, cin), dtype)] if pad_y > 0 else []
    z = pl.pallas_call(
        ka,
        out_shape=jax.ShapeDtypeStruct((n, ho, w, r), dtype),
        grid=(n, w // tw),
        in_specs=[pl.BlockSpec((None, h, tw, cin), lambda i, j: (i, 0, j, 0)),
                  pl.BlockSpec((k_y, cin, r), lambda i, j: (0, 0, 0))],
        out_specs=pl.BlockSpec((None, ho, tw, r), lambda i, j: (i, 0, j, 0)),
        scratch_shapes=scratch_a,
        compiler_params=cparams,
    )(x, wfa)

    # ---- kernel B: fused [depthwise (1, k_x)] + [1x1 rank->out + bias] -----
    tho = _pick_tile(ho, (wp * r + wo * cout) * isz * 2)
    kb = functools.partial(_stage34_kernel,
                           k_taps=k_x, dil=dx, stride=sx, pad=pad_x)
    scratch_b = [pltpu.VMEM((tho, wp, r), dtype)] if pad_x > 0 else []
    y = pl.pallas_call(
        kb,
        out_shape=jax.ShapeDtypeStruct((n, ho, wo, cout), dtype),
        grid=(n, ho // tho),
        in_specs=[pl.BlockSpec((None, tho, w, r), lambda i, j: (i, j, 0, 0)),
                  pl.BlockSpec((k_x, r, cout), lambda i, j: (0, 0, 0)),
                  pl.BlockSpec((1, cout), lambda i, j: (0, 0))],
        out_specs=pl.BlockSpec((None, tho, wo, cout), lambda i, j: (i, j, 0, 0)),
        scratch_shapes=scratch_b,
        compiler_params=cparams,
    )(z, wfb, b2)

    return jnp.transpose(y, (0, 3, 1, 2))                    # NHWC -> NCHW


# ---------------------- pure-JAX reference (for checking) -------------------

def ref_forward(x, w1, wy, wx, w4, bias, cfg):
    dn = ("NCHW", "OIHW", "NCHW")
    pad_y, pad_x = cfg["padding"]
    sy, sx = cfg["stride"]
    dy, dx = cfg["dilation"]
    r = w1.shape[1]
    w1_o = jnp.transpose(w1)[:, :, None, None]         # (R, Cin, 1, 1)
    wy_o = jnp.transpose(wy)[:, None, :, None]         # (R, 1, Ky, 1)
    wx_o = jnp.transpose(wx)[:, None, None, :]         # (R, 1, 1, Kx)
    w4_o = jnp.transpose(w4)[:, :, None, None]         # (Cout, R, 1, 1)
    y = lax.conv_general_dilated(x, w1_o, (1, 1), "VALID", dimension_numbers=dn)
    y = lax.conv_general_dilated(y, wy_o, (sy, 1), [(pad_y, pad_y), (0, 0)],
                                 rhs_dilation=(dy, 1), feature_group_count=r,
                                 dimension_numbers=dn)
    y = lax.conv_general_dilated(y, wx_o, (1, sx), [(0, 0), (pad_x, pad_x)],
                                 rhs_dilation=(1, dx), feature_group_count=r,
                                 dimension_numbers=dn)
    y = lax.conv_general_dilated(y, w4_o, (1, 1), "VALID", dimension_numbers=dn)
    return y + bias[None, :, None, None]


# --------------------------------- main --------------------------------------

if __name__ == "__main__":
    # CPConv2d(nn.Conv2d(4, 8, 3, padding=1, bias=True), rank=6) equivalent.
    N, Cin, H, W = 2, 4, 16, 16
    Cout, rank = 8, 6
    k_y, k_x = 3, 3
    cfg = dict(padding=(1, 1), stride=(1, 1), dilation=(1, 1))

    key = jax.random.PRNGKey(0)
    ks = jax.random.split(key, 6)
    x = jax.random.normal(ks[0], (N, Cin, H, W), jnp.float32)
    w1 = jax.random.normal(ks[1], (Cin, rank), jnp.float32) * 0.3   # model[0]
    wy = jax.random.normal(ks[2], (k_y, rank), jnp.float32) * 0.3   # model[1]
    wx = jax.random.normal(ks[3], (k_x, rank), jnp.float32) * 0.3   # model[2]
    w4 = jax.random.normal(ks[4], (rank, Cout), jnp.float32) * 0.3  # model[3].weight
    bias = jax.random.normal(ks[5], (Cout,), jnp.float32) * 0.1     # model[3].bias

    out = cp_conv2d_forward(x, (w1, wy, wx, w4, bias), cfg)
    out = jax.block_until_ready(out)

    ref = ref_forward(x, w1, wy, wx, w4, bias, cfg)
    assert out.shape == ref.shape == (N, Cout, H, W), (out.shape, ref.shape)
    err = float(jnp.max(jnp.abs(out - ref)))
    assert jnp.allclose(out, ref, atol=1e-4, rtol=1e-4), err

    print("KERNEL_OK")
</pallas_src>

<mosaic_0001>
module attributes {stable_mosaic.version = 11 : i64} {
  func.func @_stage12_kernel(%arg0: i32, %arg1: i32, %arg2: memref<1x16x16x4xf32, #tpu.memory_space<vmem>>, %arg3: memref<3x4x6xf32, #tpu.memory_space<vmem>>, %arg4: memref<1x16x16x6xf32, #tpu.memory_space<vmem>>, %arg5: memref<18x16x4xf32, #tpu.memory_space<vmem>>) attributes {dimension_semantics = [#tpu.dimension_semantics<parallel>, #tpu.dimension_semantics<parallel>], iteration_bounds = array<i64: 2, 1>, scalar_prefetch = 0 : i64, scratch_operands = 1 : i64, tpu.core_type = #tpu.core_type<tc>, window_params = [{transform_indices = @transform_0, window_bounds = array<i64: 1, 16, 16, 4>}, {pipeline_mode = #tpu.pipeline_mode<synchronous>, transform_indices = @transform_1, window_bounds = array<i64: 3, 4, 6>}, {transform_indices = @transform_2, window_bounds = array<i64: 1, 16, 16, 6>}]} {
    %cst = arith.constant 0.000000e+00 : f32
    %0 = vector.broadcast %cst : f32 to vector<18x16x4xf32>
    %c0 = arith.constant 0 : index
    %c0_0 = arith.constant 0 : index
    %c0_1 = arith.constant 0 : index
    %1 = vector.load %arg5[%c0, %c0_0, %c0_1] : memref<18x16x4xf32, #tpu.memory_space<vmem>>, vector<18x16x4xf32>
    tpu.vector_store %arg5[%c0, %c0_0, %c0_1], %0 {strides = array<i32>} : memref<18x16x4xf32, #tpu.memory_space<vmem>>, vector<18x16x4xf32>,
    %c0_2 = arith.constant 0 : index
    %c0_3 = arith.constant 0 : index
    %c0_4 = arith.constant 0 : index
    %c0_5 = arith.constant 0 : index
    %2 = vector.load %arg2[%c0_2, %c0_3, %c0_4, %c0_5] : memref<1x16x16x4xf32, #tpu.memory_space<vmem>>, vector<1x16x16x4xf32>
    %3 = vector.shape_cast %2 : vector<1x16x16x4xf32> to vector<16x16x4xf32>
    %c1 = arith.constant 1 : index
    %c0_6 = arith.constant 0 : index
    %c0_7 = arith.constant 0 : index
    %4 = vector.load %arg5[%c1, %c0_6, %c0_7] : memref<18x16x4xf32, #tpu.memory_space<vmem>>, vector<16x16x4xf32>
    tpu.vector_store %arg5[%c1, %c0_6, %c0_7], %3 {strides = array<i32>} : memref<18x16x4xf32, #tpu.memory_space<vmem>>, vector<16x16x4xf32>,
    %cst_8 = arith.constant 0.000000e+00 : f32
    %5 = vector.broadcast %cst_8 : f32 to vector<256x6xf32>
    %c0_9 = arith.constant 0 : index
    %c0_10 = arith.constant 0 : index
    %c0_11 = arith.constant 0 : index
    %6 = vector.load %arg5[%c0_9, %c0_10, %c0_11] : memref<18x16x4xf32, #tpu.memory_space<vmem>>, vector<16x16x4xf32>
    %7 = vector.shape_cast %6 : vector<16x16x4xf32> to vector<256x4xf32>
    %c0_12 = arith.constant 0 : index
    %c0_13 = arith.constant 0 : index
    %c0_14 = arith.constant 0 : index
    %8 = vector.load %arg3[%c0_12, %c0_13, %c0_14] : memref<3x4x6xf32, #tpu.memory_space<vmem>>, vector<1x4x6xf32>
    %9 = vector.shape_cast %8 : vector<1x4x6xf32> to vector<4x6xf32>
    %cst_15 = arith.constant dense<0.000000e+00> : vector<256x6xf32>
    %10 = tpu.matmul %7, %9, %cst_15 {dimension_numbers = #tpu.dot_dimension_numbers<[1], [0], [0], [1], [0, 0, 1, 1], [], []>} : vector<256x4xf32>, vector<4x6xf32>, vector<256x6xf32> -> vector<256x6xf32>
    %11 = arith.addf %5, %10 : vector<256x6xf32>
    %c1_16 = arith.constant 1 : index
    %c0_17 = arith.constant 0 : index
    %c0_18 = arith.constant 0 : index
    %12 = vector.load %arg5[%c1_16, %c0_17, %c0_18] : memref<18x16x4xf32, #tpu.memory_space<vmem>>, vector<16x16x4xf32>
    %13 = vector.shape_cast %12 : vector<16x16x4xf32> to vector<256x4xf32>
    %c1_19 = arith.constant 1 : index
    %c0_20 = arith.constant 0 : index
    %c0_21 = arith.constant 0 : index
    %14 = vector.load %arg3[%c1_19, %c0_20, %c0_21] : memref<3x4x6xf32, #tpu.memory_space<vmem>>, vector<1x4x6xf32>
    %15 = vector.shape_cast %14 : vector<1x4x6xf32> to vector<4x6xf32>
    %cst_22 = arith.constant dense<0.000000e+00> : vector<256x6xf32>
    %16 = tpu.matmul %13, %15, %cst_22 {dimension_numbers = #tpu.dot_dimension_numbers<[1], [0], [0], [1], [0, 0, 1, 1], [], []>} : vector<256x4xf32>, vector<4x6xf32>, vector<256x6xf32> -> vector<256x6xf32>
    %17 = arith.addf %11, %16 : vector<256x6xf32>
    %c2 = arith.constant 2 : index
    %c0_23 = arith.constant 0 : index
    %c0_24 = arith.constant 0 : index
    %18 = vector.load %arg5[%c2, %c0_23, %c0_24] : memref<18x16x4xf32, #tpu.memory_space<vmem>>, vector<16x16x4xf32>
    %19 = vector.shape_cast %18 : vector<16x16x4xf32> to vector<256x4xf32>
    %c2_25 = arith.constant 2 : index
    %c0_26 = arith.constant 0 : index
    %c0_27 = arith.constant 0 : index
    %20 = vector.load %arg3[%c2_25, %c0_26, %c0_27] : memref<3x4x6xf32, #tpu.memory_space<vmem>>, vector<1x4x6xf32>
    %21 = vector.shape_cast %20 : vector<1x4x6xf32> to vector<4x6xf32>
    %cst_28 = arith.constant dense<0.000000e+00> : vector<256x6xf32>
    %22 = tpu.matmul %19, %21, %cst_28 {dimension_numbers = #tpu.dot_dimension_numbers<[1], [0], [0], [1], [0, 0, 1, 1], [], []>} : vector<256x4xf32>, vector<4x6xf32>, vector<256x6xf32> -> vector<256x6xf32>
    %23 = arith.addf %17, %22 : vector<256x6xf32>
    %24 = vector.shape_cast %23 : vector<256x6xf32> to vector<16x16x6xf32>
    %c0_29 = arith.constant 0 : index
    %c0_30 = arith.constant 0 : index
    %c0_31 = arith.constant 0 : index
    %c0_32 = arith.constant 0 : index
    %25 = vector.load %arg4[%c0_29, %c0_30, %c0_31, %c0_32] : memref<1x16x16x6xf32, #tpu.memory_space<vmem>>, vector<1x16x16x6xf32>
    %26 = vector.shape_cast %25 : vector<1x16x16x6xf32> to vector<16x16x6xf32>
    %27 = vector.shape_cast %24 : vector<16x16x6xf32> to vector<1x16x16x6xf32>
    tpu.vector_store %arg4[%c0_29, %c0_30, %c0_31, %c0_32], %27 {strides = array<i32>} : memref<1x16x16x6xf32, #tpu.memory_space<vmem>>, vector<1x16x16x6xf32>,
    return
  }
  func.func @transform_0(%arg0: i32, %arg1: i32) -> (i32, i32, i32, i32) {
    %c0_i32 = arith.constant 0 : i32
    %c0_i32_0 = arith.constant 0 : i32
    %c0_i32_1 = arith.constant 0 : i32
    return %arg0, %c0_i32, %arg1, %c0_i32_0 : i32, i32, i32, i32
  }
  func.func @transform_1(%arg0: i32, %arg1: i32) -> (i32, i32, i32) {
    %c0_i32 = arith.constant 0 : i32
    %c0_i32_0 = arith.constant 0 : i32
    %c0_i32_1 = arith.constant 0 : i32
    %c0_i32_2 = arith.constant 0 : i32
    return %c0_i32, %c0_i32_0, %c0_i32_1 : i32, i32, i32
  }
  func.func @transform_2(%arg0: i32, %arg1: i32) -> (i32, i32, i32, i32) {
    %c0_i32 = arith.constant 0 : i32
    %c0_i32_0 = arith.constant 0 : i32
    %c0_i32_1 = arith.constant 0 : i32
    return %arg0, %c0_i32, %arg1, %c0_i32_0 : i32, i32, i32, i32
  }
}

</mosaic_0001>

<bundles_post_ra>
// kernel: tpu_custom_call.1
= control target key start
LH: loop header
LB: loop body
LE: loop exit
PB: predicated region body
PF: predicated region fallthrough
CT: control target
= control target key end

     0   :  { %s1942_s9 = smov 0   ;;  %s1944_s10 = smov 0   ;;  %s2454_s0 = inlined_call_operand.vmem [shape: f32[2,16,16,4], index: 0, kind: input, shape index: {}]   ;;  %s2455_s1 = inlined_call_operand.vmem [shape: f32[3,4,6], index: 1, kind: input, shape index: {}]   ;;  %s2456_s2 = inlined_call_operand.vmem [shape: f32[2,16,16,6], index: 2, kind: output, shape index: {}]  }
   0x1   :  { %s1946_s11 = smov 0  }
   0x2 LB: > { %s24_s12 = sadd.s32 1, %s1920_s10  ;;  %p1516_p0 = scmp.ge.s32.totalorder %s1924_s11, 1  ;;  %s1924_s11 = sphi %s1946_s11, %s12_s11   ;;  %s1920_s10 = sphi %s1944_s10, %s2458_s10   ;;  %s1916_s9 = sphi %s1942_s9, %s2457_s9  }
   0x3   : > { %p26_p1 = scmp.ge.s32.totalorder %s24_s12, 2  ;;  %p133_p2 = scmp.lt.s32.totalorder %s1924_s11, 3 }
   0x5   : > { %s2460_s12 = smov (%p26_p1, %s24_s12), 0  ;;  %p134_p3 = pnand %p1516_p0, %p133_p2 }
   0x6   : > { %p164_p4 = scmp.lt.s32.totalorder (!%p134_p3), %s1916_s9, 1 }
   0x7   : > { %137 = sbr.rel (%p134_p3) target bundleno = 333 (0x14d), region = 28 }
   0xc   : > { %v1521_v0 = vld [vmem:[%s2455_s1 + $0x4] sm:$0xf]  ;;  %vm448_vm0 = vcmask 1043456   ;;  %vm183_vm1 = vcmask 31744   ;;  %v1926_v1 = vmov 0.0   ;;  %s2462_s9 = smov (!%p164_p4, %s1916_s9), 1 }
   0xd   : > { %1875 = vmatprep.subr.msk.mxu1 %vm448_vm0, %v1521_v0  ;;  %1725 = vmatprep.subr.msk.mxu0 %vm448_vm0, %v1521_v0  ;;  %186 = vst.msk [vmem:[#allocation2 + $0x10] sm:$0xff] %vm183_vm1, %v1926_v1  ;;  %184 = vst.msk [vmem:[#allocation2] sm:$0xff] %vm183_vm1, %v1926_v1  ;;  %v2007_v2 = vld [vmem:[%s2455_s1] sm:$0xf]  ;;  %v2012_v3 = vld [vmem:[%s2455_s1 + $0x8] sm:$0xf] }
   0xe   : > { %185 = vst.msk [vmem:[#allocation2 + $0x8] sm:$0xff] %vm183_vm1, %v1926_v1  ;;  %187 = vst.msk [vmem:[#allocation2 + $0x18] sm:$0xff] %vm183_vm1, %v1926_v1  ;;  %1876 = vmatpush3.msk.msra.mxu1 %vm448_vm0, %v1521_v0  ;;  %1726 = vmatpush3.msk.msra.mxu0 %vm448_vm0, %v1521_v0  ;;  %s1624_s19 = sshll.u32 %s2462_s9, 8  ;;  %vm1392_vm2 = vcmask 48128  }
   0xf   : > { %188 = vst.msk [vmem:[#allocation2 + $0x20] sm:$0xff] %vm183_vm1, %v1926_v1  ;;  %189 = vst.msk [vmem:[#allocation2 + $0x28] sm:$0xff] %vm183_vm1, %v1926_v1  ;;  %1775 = vmatprep.subr.msk.mxu1 %vm448_vm0, %v2007_v2  ;;  %1825 = vmatprep.subr.msk.mxu0 %vm448_vm0, %v2012_v3  ;;  %s2031_s22 = scalar_lea.vmem %s2454_s0, %s1624_s19  ;;  %s2357_s25 = scalar_lea.vmem %s2456_s2, %s1624_s19 }
  0x10   : > { %190 = vst.msk [vmem:[#allocation2 + $0x30] sm:$0xff] %vm183_vm1, %v1926_v1  ;;  %191 = vst.msk [vmem:[#allocation2 + $0x38] sm:$0xff] %vm183_vm1, %v1926_v1  ;;  %v220_v4 = vld [vmem:[%s2031_s22] sm:$0xff]  ;;  %v221_v6 = vld [vmem:[%s2031_s22 + $0x8] sm:$0xff] }
  0x11   : > { %192 = vst.msk [vmem:[#allocation2 + $0x40] sm:$0xff] %vm183_vm1, %v1926_v1  ;;  %193 = vst.msk [vmem:[#allocation2 + $0x48] sm:$0xff] %vm183_vm1, %v1926_v1  ;;  %v236_v5 = vld [vmem:[%s2031_s22 + $0x80] sm:$0xff]  ;;  %v237_v7 = vld [vmem:[%s2031_s22 + $0x88] sm:$0xff] }
  0x12   : > { %194 = vst.msk [vmem:[#allocation2 + $0x50] sm:$0xff] %vm183_vm1, %v1926_v1  ;;  %195 = vst.msk [vmem:[#allocation2 + $0x58] sm:$0xff] %vm183_vm1, %v1926_v1  ;;  %v222_v8 = vld [vmem:[%s2031_s22 + $0x10] sm:$0xff]  ;;  %v223_v10 = vld [vmem:[%s2031_s22 + $0x18] sm:$0xff] }
  0x13   : > { %196 = vst.msk [vmem:[#allocation2 + $0x60] sm:$0xff] %vm183_vm1, %v1926_v1  ;;  %197 = vst.msk [vmem:[#allocation2 + $0x68] sm:$0xff] %vm183_vm1, %v1926_v1  ;;  %v238_v9 = vld [vmem:[%s2031_s22 + $0x90] sm:$0xff]  ;;  %v239_v11 = vld [vmem:[%s2031_s22 + $0x98] sm:$0xff] }
  0x14   : > { %198 = vst.msk [vmem:[#allocation2 + $0x70] sm:$0xff] %vm183_vm1, %v1926_v1  ;;  %199 = vst.msk [vmem:[#allocation2 + $0x78] sm:$0xff] %vm183_vm1, %v1926_v1  ;;  %v224_v12 = vld [vmem:[%s2031_s22 + $0x20] sm:$0xff]  ;;  %v225_v14 = vld [vmem:[%s2031_s22 + $0x28] sm:$0xff] }
  0x15   : > { %200 = vst.msk [vmem:[#allocation2 + $0x80] sm:$0xff] %vm183_vm1, %v1926_v1  ;;  %201 = vst.msk [vmem:[#allocation2 + $0x88] sm:$0xff] %vm183_vm1, %v1926_v1  ;;  %v240_v13 = vld [vmem:[%s2031_s22 + $0xa0] sm:$0xff]  ;;  %v241_v15 = vld [vmem:[%s2031_s22 + $0xa8] sm:$0xff] }
  0x16   : > { %202 = vst.msk [vmem:[#allocation2 + $0x90] sm:$0xff] %vm183_vm1, %v1926_v1  ;;  %203 = vst.msk [vmem:[#allocation2 + $0x98] sm:$0xff] %vm183_vm1, %v1926_v1  ;;  %v226_v16 = vld [vmem:[%s2031_s22 + $0x30] sm:$0xff]  ;;  %v227_v18 = vld [vmem:[%s2031_s22 + $0x38] sm:$0xff] }
  0x17   : > { %204 = vst.msk [vmem:[#allocation2 + $0xa0] sm:$0xff] %vm183_vm1, %v1926_v1  ;;  %205 = vst.msk [vmem:[#allocation2 + $0xa8] sm:$0xff] %vm183_vm1, %v1926_v1  ;;  %v242_v17 = vld [vmem:[%s2031_s22 + $0xb0] sm:$0xff]  ;;  %v243_v19 = vld [vmem:[%s2031_s22 + $0xb8] sm:$0xff] }
  0x18   : > { %206 = vst.msk [vmem:[#allocation2 + $0xb0] sm:$0xff] %vm183_vm1, %v1926_v1  ;;  %207 = vst.msk [vmem:[#allocation2 + $0xb8] sm:$0xff] %vm183_vm1, %v1926_v1  ;;  %v228_v20 = vld [vmem:[%s2031_s22 + $0x40] sm:$0xff]  ;;  %v229_v22 = vld [vmem:[%s2031_s22 + $0x48] sm:$0xff] }
  0x19   : > { %208 = vst.msk [vmem:[#allocation2 + $0xc0] sm:$0xff] %vm183_vm1, %v1926_v1  ;;  %209 = vst.msk [vmem:[#allocation2 + $0xc8] sm:$0xff] %vm183_vm1, %v1926_v1  ;;  %v244_v21 = vld [vmem:[%s2031_s22 + $0xc0] sm:$0xff]  ;;  %v245_v23 = vld [vmem:[%s2031_s22 + $0xc8] sm:$0xff] }
  0x1a   : > { %210 = vst.msk [vmem:[#allocation2 + $0xd0] sm:$0xff] %vm183_vm1, %v1926_v1  ;;  %211 = vst.msk [vmem:[#allocation2 + $0xd8] sm:$0xff] %vm183_vm1, %v1926_v1  ;;  %v230_v24 = vld [vmem:[%s2031_s22 + $0x50] sm:$0xff]  ;;  %v231_v26 = vld [vmem:[%s2031_s22 + $0x58] sm:$0xff] }
  0x1b   : > { %212 = vst.msk [vmem:[#allocation2 + $0xe0] sm:$0xff] %vm183_vm1, %v1926_v1  ;;  %213 = vst.msk [vmem:[#allocation2 + $0xe8] sm:$0xff] %vm183_vm1, %v1926_v1  ;;  %v246_v25 = vld [vmem:[%s2031_s22 + $0xd0] sm:$0xff]  ;;  %v247_v27 = vld [vmem:[%s2031_s22 + $0xd8] sm:$0xff] }
  0x1c   : > { %214 = vst.msk [vmem:[#allocation2 + $0xf0] sm:$0xff] %vm183_vm1, %v1926_v1  ;;  %215 = vst.msk [vmem:[#allocation2 + $0xf8] sm:$0xff] %vm183_vm1, %v1926_v1  ;;  %v232_v42 = vld [vmem:[%s2031_s22 + $0x60] sm:$0xff]  ;;  %v233_v44 = vld [vmem:[%s2031_s22 + $0x68] sm:$0xff] }
  0x1d   : > { %216 = vst.msk [vmem:[#allocation2 + $0x100] sm:$0xff] %vm183_vm1, %v1926_v1  ;;  %217 = vst.msk [vmem:[#allocation2 + $0x108] sm:$0xff] %vm183_vm1, %v1926_v1  ;;  %v248_v43 = vld [vmem:[%s2031_s22 + $0xe0] sm:$0xff]  ;;  %v249_v45 = vld [vmem:[%s2031_s22 + $0xe8] sm:$0xff] }
  0x1e   : > { %218 = vst.msk [vmem:[#allocation2 + $0x110] sm:$0xff] %vm183_vm1, %v1926_v1  ;;  %219 = vst.msk [vmem:[#allocation2 + $0x118] sm:$0xff] %vm183_vm1, %v1926_v1  ;;  %v234_v46 = vld [vmem:[%s2031_s22 + $0x70] sm:$0xff]  ;;  %v235_v48 = vld [vmem:[%s2031_s22 + $0x78] sm:$0xff] }
  0x1f   : > { %253 = vst.msk [vmem:[#allocation2 + $0x10] sm:$0xff] %vm183_vm1, %v220_v4  ;;  %269 = vst.msk [vmem:[#allocation2 + $0x90] sm:$0xff] %vm183_vm1, %v236_v5  ;;  %v250_v47 = vld [vmem:[%s2031_s22 + $0xf0] sm:$0xff]  ;;  %v251_v49 = vld [vmem:[%s2031_s22 + $0xf8] sm:$0xff] }
  0x20   : > { %254 = vst.msk [vmem:[#allocation2 + $0x18] sm:$0xff] %vm183_vm1, %v221_v6  ;;  %270 = vst.msk [vmem:[#allocation2 + $0x98] sm:$0xff] %vm183_vm1, %v237_v7  ;;  %v285_v4 = vld [vmem:[#allocation2] sm:$0xff]  ;;  %v286_v5 = vld [vmem:[#allocation2 + $0x8] sm:$0xff] }
  0x21   : > { %255 = vst.msk [vmem:[#allocation2 + $0x20] sm:$0xff] %vm183_vm1, %v222_v8  ;;  %271 = vst.msk [vmem:[#allocation2 + $0xa0] sm:$0xff] %vm183_vm1, %v238_v9 }
  0x22   : > { %256 = vst.msk [vmem:[#allocation2 + $0x28] sm:$0xff] %vm183_vm1, %v223_v10  ;;  %272 = vst.msk [vmem:[#allocation2 + $0xa8] sm:$0xff] %vm183_vm1, %v239_v11 }
  0x23   : > { %257 = vst.msk [vmem:[#allocation2 + $0x30] sm:$0xff] %vm183_vm1, %v224_v12  ;;  %273 = vst.msk [vmem:[#allocation2 + $0xb0] sm:$0xff] %vm183_vm1, %v240_v13 }
  0x24   : > { %258 = vst.msk [vmem:[#allocation2 + $0x38] sm:$0xff] %vm183_vm1, %v225_v14  ;;  %274 = vst.msk [vmem:[#allocation2 + $0xb8] sm:$0xff] %vm183_vm1, %v241_v15 }
  0x25   : > { %259 = vst.msk [vmem:[#allocation2 + $0x40] sm:$0xff] %vm183_vm1, %v226_v16  ;;  %275 = vst.msk [vmem:[#allocation2 + $0xc0] sm:$0xff] %vm183_vm1, %v242_v17  ;;  %v1032_v6 = vld [vmem:[#allocation2 + $0x110] sm:$0xff]  ;;  %v1033_v7 = vld [vmem:[#allocation2 + $0x118] sm:$0xff] }
  0x26   : > { %260 = vst.msk [vmem:[#allocation2 + $0x48] sm:$0xff] %vm183_vm1, %v227_v18  ;;  %276 = vst.msk [vmem:[#allocation2 + $0xc8] sm:$0xff] %vm183_vm1, %v243_v19  ;;  %v2078_v28 = vld [vmem:[#allocation2 + $0x10] sm:$0xff] }
  0x27   : > { %261 = vst.msk [vmem:[#allocation2 + $0x50] sm:$0xff] %vm183_vm1, %v228_v20  ;;  %277 = vst.msk [vmem:[#allocation2 + $0xd0] sm:$0xff] %vm183_vm1, %v244_v21  ;;  %v2080_v29 = vld [vmem:[#allocation2 + $0x90] sm:$0xff]  ;;  %v2082_v30 = vld [vmem:[#allocation2 + $0x18] sm:$0xff]  ;;  %1727 = vmatprep.mubr.msk.f32.mxu0 %vm183_vm1, %v2078_v28 }
  0x28   : > { %262 = vst.msk [vmem:[#allocation2 + $0x58] sm:$0xff] %vm183_vm1, %v229_v22  ;;  %278 = vst.msk [vmem:[#allocation2 + $0xd8] sm:$0xff] %vm183_vm1, %v245_v23  ;;  %1751 = vmatprep.mubr.msk.f32.mxu1 %vm183_vm1, %v2080_v29  ;;  %v2091_v31 = vld [vmem:[#allocation2 + $0x98] sm:$0xff]  ;;  %v2093_v32 = vld [vmem:[#allocation2 + $0x20] sm:$0xff]  ;;  %1728 = vmatmul.mubr.msk.f32.vlgmr.msra.gmra.mxu0 %vm183_vm1, %v2082_v30 }
  0x29   : > { %263 = vst.msk [vmem:[#allocation2 + $0x60] sm:$0xff] %vm183_vm1, %v230_v24  ;;  %279 = vst.msk [vmem:[#allocation2 + $0xe0] sm:$0xff] %vm183_vm1, %v246_v25  ;;  %v2095_v33 = vld [vmem:[#allocation2 + $0xa0] sm:$0xff]  ;;  %1752 = vmatmul.mubr.msk.f32.vlgmr.msra.gmra.mxu1 %vm183_vm1, %v2091_v31  ;;  %1826 = vmatpush3.msk.msra.mxu0 %vm448_vm0, %v2012_v3  ;;  %v2105_v34 = vld [vmem:[#allocation2 + $0x28] sm:$0xff] }
  0x2a   : > { %264 = vst.msk [vmem:[#allocation2 + $0x68] sm:$0xff] %vm183_vm1, %v231_v26  ;;  %280 = vst.msk [vmem:[#allocation2 + $0xe8] sm:$0xff] %vm183_vm1, %v247_v27  ;;  %1776 = vmatpush3.msk.msra.mxu1 %vm448_vm0, %v2007_v2  ;;  %v2107_v35 = vld [vmem:[#allocation2 + $0xa8] sm:$0xff]  ;;  %1730 = vmatprep.mubr.msk.f32.mxu0 %vm183_vm1, %v2093_v32  ;;  %v2113_v36 = vld [vmem:[#allocation2 + $0x30] sm:$0xff] }
  0x2b   : > { %1754 = vmatprep.mubr.msk.f32.mxu1 %vm183_vm1, %v2095_v33  ;;  %v2115_v37 = vld [vmem:[#allocation2 + $0xb0] sm:$0xff]  ;;  %v2121_v38 = vld [vmem:[#allocation2 + $0x38] sm:$0xff]  ;;  %265 = vst.msk [vmem:[#allocation2 + $0x70] sm:$0xff] %vm183_vm1, %v232_v42  ;;  %281 = vst.msk [vmem:[#allocation2 + $0xf0] sm:$0xff] %vm183_vm1, %v248_v43 }
  0x2c   : > { %1731 = vmatmul.mubr.msk.f32.gmra.mxu0 %vm183_vm1, %v2105_v34  ;;  %v2127_v39 = vld [vmem:[#allocation2 + $0xb8] sm:$0xff]  ;;  %v2129_v40 = vld [vmem:[#allocation2 + $0x40] sm:$0xff]  ;;  %266 = vst.msk [vmem:[#allocation2 + $0x78] sm:$0xff] %vm183_vm1, %v233_v44  ;;  %282 = vst.msk [vmem:[#allocation2 + $0xf8] sm:$0xff] %vm183_vm1, %v249_v45 }
  0x2d   : > { %1755 = vmatmul.mubr.msk.f32.gmra.mxu1 %vm183_vm1, %v2107_v35  ;;  %1733 = vmatprep.mubr.msk.f32.mxu0 %vm183_vm1, %v2113_v36  ;;  %v2131_v41 = vld [vmem:[#allocation2 + $0xc0] sm:$0xff]  ;;  %267 = vst.msk [vmem:[#allocation2 + $0x80] sm:$0xff] %vm183_vm1, %v234_v46  ;;  %283 = vst.msk [vmem:[#allocation2 + $0x100] sm:$0xff] %vm183_vm1, %v250_v47  ;;  %v325_v50 = vld [vmem:[#allocation2 + $0x48] sm:$0xff] }
  0x2e   : > { %1757 = vmatprep.mubr.msk.f32.mxu1 %vm183_vm1, %v2115_v37  ;;  %v2155_v51 = vld [vmem:[#allocation2 + $0xc8] sm:$0xff]  ;;  %268 = vst.msk [vmem:[#allocation2 + $0x88] sm:$0xff] %vm183_vm1, %v235_v48  ;;  %284 = vst.msk [vmem:[#allocation2 + $0x108] sm:$0xff] %vm183_vm1, %v251_v49  ;;  %v326_v52 = vld [vmem:[#allocation2 + $0x50] sm:$0xff] }
  0x2f   : > { %v2159_v53 = vld [vmem:[#allocation2 + $0xd0] sm:$0xff]  ;;  %v327_v54 = vld [vmem:[#allocation2 + $0x58] sm:$0xff] }
  0x30   : > { %1734 = vmatmul.mubr.msk.f32.gmra.mxu0 %vm183_vm1, %v2121_v38  ;;  %v2167_v55 = vld [vmem:[#allocation2 + $0xd8] sm:$0xff]  ;;  %v328_v56 = vld [vmem:[#allocation2 + $0x60] sm:$0xff] }
  0x31   : > { %1758 = vmatmul.mubr.msk.f32.gmra.mxu1 %vm183_vm1, %v2127_v39  ;;  %1736 = vmatprep.mubr.msk.f32.mxu0 %vm183_vm1, %v2129_v40  ;;  %v2169_v57 = vld [vmem:[#allocation2 + $0xe0] sm:$0xff]  ;;  %v329_v58 = vld [vmem:[#allocation2 + $0x68] sm:$0xff] }
  0x32   : > { %1760 = vmatprep.mubr.msk.f32.mxu1 %vm183_vm1, %v2131_v41  ;;  %v2177_v59 = vld [vmem:[#allocation2 + $0xe8] sm:$0xff]  ;;  %v330_v60 = vld [vmem:[#allocation2 + $0x70] sm:$0xff] }
  0x33   : > { %v2179_v61 = vld [vmem:[#allocation2 + $0xf0] sm:$0xff]  ;;  %v331_v62 = vld [vmem:[#allocation2 + $0x78] sm:$0xff] }
  0x34   : > { %1737 = vmatmul.mubr.msk.f32.gmra.mxu0 %vm183_vm1, %v325_v50  ;;  %v2187_v63 = vld [vmem:[#allocation2 + $0xf8] sm:$0xff]  ;;  %v332_v0 = vld [vmem:[#allocation2 + $0x80] sm:$0xff] }
  0x35   : > { %1761 = vmatmul.mubr.msk.f32.gmra.mxu1 %vm183_vm1, %v2155_v51  ;;  %1739 = vmatprep.mubr.msk.f32.mxu0 %vm183_vm1, %v326_v52  ;;  %v2189_v1 = vld [vmem:[#allocation2 + $0x100] sm:$0xff]  ;;  %v333_v2 = vld [vmem:[#allocation2 + $0x88] sm:$0xff] }
  0x36   : > { %1763 = vmatprep.mubr.msk.f32.mxu1 %vm183_vm1, %v2159_v53  ;;  %v2197_v3 = vld [vmem:[#allocation2 + $0x108] sm:$0xff] }
  0x38   : > { %1740 = vmatmul.mubr.msk.f32.gmra.mxu0 %vm183_vm1, %v327_v54 }
  0x39   : > { %1764 = vmatmul.mubr.msk.f32.gmra.mxu1 %vm183_vm1, %v2167_v55  ;;  %1742 = vmatprep.mubr.msk.f32.mxu0 %vm183_vm1, %v328_v56 }
  0x3a   : > { %1766 = vmatprep.mubr.msk.f32.mxu1 %vm183_vm1, %v2169_v57 }
  0x3c   : > { %1743 = vmatmul.mubr.msk.f32.gmra.mxu0 %vm183_vm1, %v329_v58 }
  0x3d   : > { %1767 = vmatmul.mubr.msk.f32.gmra.mxu1 %vm183_vm1, %v2177_v59  ;;  %1745 = vmatprep.mubr.msk.f32.mxu0 %vm183_vm1, %v330_v60 }
  0x3e   : > { %1769 = vmatprep.mubr.msk.f32.mxu1 %vm183_vm1, %v2179_v61 }
  0x40   : > { %1746 = vmatmul.mubr.msk.f32.gmra.mxu0 %vm183_vm1, %v331_v62 }
  0x41   : > { %1770 = vmatmul.mubr.msk.f32.gmra.mxu1 %vm183_vm1, %v2187_v63  ;;  %1748 = vmatprep.mubr.msk.f32.mxu0 %vm183_vm1, %v332_v0 }
  0x42   : > { %1772 = vmatprep.mubr.msk.f32.mxu1 %vm183_vm1, %v2189_v1 }
  0x44   : > { %1749 = vmatmul.mubr.msk.f32.gmra.mxu0 %vm183_vm1, %v333_v2 }
  0x45   : > { %1773 = vmatmul.mubr.msk.f32.gmra.mxu1 %vm183_vm1, %v2197_v3  ;;  %1827 = vmatprep.mubr.msk.f32.mxu0 %vm183_vm1, %v2093_v32 }
  0x46   : > { %1777 = vmatprep.mubr.msk.f32.mxu1 %vm183_vm1, %v285_v4 }
  0x48   : > { %1828 = vmatmul.mubr.msk.f32.vlgmr.msra.gmra.mxu0 %vm183_vm1, %v2105_v34 }
  0x49   : > { %1778 = vmatmul.mubr.msk.f32.vlgmr.msra.gmra.mxu1 %vm183_vm1, %v286_v5  ;;  %1830 = vmatprep.mubr.msk.f32.mxu0 %vm183_vm1, %v2113_v36 }
  0x4a   : > { %1780 = vmatprep.mubr.msk.f32.mxu1 %vm183_vm1, %v2078_v28 }
  0x4c   : > { %1831 = vmatmul.mubr.msk.f32.gmra.mxu0 %vm183_vm1, %v2121_v38 }
  0x4d   : > { %1781 = vmatmul.mubr.msk.f32.gmra.mxu1 %vm183_vm1, %v2082_v30  ;;  %1833 = vmatprep.mubr.msk.f32.mxu0 %vm183_vm1, %v2129_v40 }
  0x4e   : > { %1783 = vmatprep.mubr.msk.f32.mxu1 %vm183_vm1, %v2093_v32 }
  0x50   : > { %1834 = vmatmul.mubr.msk.f32.gmra.mxu0 %vm183_vm1, %v325_v50 }
  0x51   : > { %1784 = vmatmul.mubr.msk.f32.gmra.mxu1 %vm183_vm1, %v2105_v34  ;;  %1836 = vmatprep.mubr.msk.f32.mxu0 %vm183_vm1, %v326_v52 }
  0x52   : > { %1786 = vmatprep.mubr.msk.f32.mxu1 %vm183_vm1, %v2113_v36 }
  0x54   : > { %1837 = vmatmul.mubr.msk.f32.gmra.mxu0 %vm183_vm1, %v327_v54 }
  0x55   : > { %1787 = vmatmul.mubr.msk.f32.gmra.mxu1 %vm183_vm1, %v2121_v38  ;;  %1839 = vmatprep.mubr.msk.f32.mxu0 %vm183_vm1, %v328_v56 }
  0x56   : > { %1789 = vmatprep.mubr.msk.f32.mxu1 %vm183_vm1, %v2129_v40 }
  0x58   : > { %1840 = vmatmul.mubr.msk.f32.gmra.mxu0 %vm183_vm1, %v329_v58 }
  0x59   : > { %1790 = vmatmul.mubr.msk.f32.gmra.mxu1 %vm183_vm1, %v325_v50  ;;  %1842 = vmatprep.mubr.msk.f32.mxu0 %vm183_vm1, %v330_v60 }
  0x5a   : > { %1792 = vmatprep.mubr.msk.f32.mxu1 %vm183_vm1, %v326_v52 }
  0x5c   : > { %1843 = vmatmul.mubr.msk.f32.gmra.mxu0 %vm183_vm1, %v331_v62 }
  0x5d   : > { %1793 = vmatmul.mubr.msk.f32.gmra.mxu1 %vm183_vm1, %v327_v54  ;;  %1845 = vmatprep.mubr.msk.f32.mxu0 %vm183_vm1, %v332_v0 }
  0x5e   : > { %1795 = vmatprep.mubr.msk.f32.mxu1 %vm183_vm1, %v328_v56 }
  0x60   : > { %1846 = vmatmul.mubr.msk.f32.gmra.mxu0 %vm183_vm1, %v333_v2 }
  0x61   : > { %1796 = vmatmul.mubr.msk.f32.gmra.mxu1 %vm183_vm1, %v329_v58  ;;  %1848 = vmatprep.mubr.msk.f32.mxu0 %vm183_vm1, %v2080_v29 }
  0x62   : > { %1798 = vmatprep.mubr.msk.f32.mxu1 %vm183_vm1, %v330_v60 }
  0x64   : > { %1849 = vmatmul.mubr.msk.f32.gmra.mxu0 %vm183_vm1, %v2091_v31 }
  0x65   : > { %1799 = vmatmul.mubr.msk.f32.gmra.mxu1 %vm183_vm1, %v331_v62  ;;  %1851 = vmatprep.mubr.msk.f32.mxu0 %vm183_vm1, %v2095_v33 }
  0x66   : > { %1801 = vmatprep.mubr.msk.f32.mxu1 %vm183_vm1, %v332_v0 }
  0x68   : > { %1852 = vmatmul.mubr.msk.f32.gmra.mxu0 %vm183_vm1, %v2107_v35 }
  0x69   : > { %1802 = vmatmul.mubr.msk.f32.gmra.mxu1 %vm183_vm1, %v333_v2  ;;  %1854 = vmatprep.mubr.msk.f32.mxu0 %vm183_vm1, %v2115_v37 }
  0x6a   : > { %1804 = vmatprep.mubr.msk.f32.mxu1 %vm183_vm1, %v2080_v29 }
  0x6c   : > { %1855 = vmatmul.mubr.msk.f32.gmra.mxu0 %vm183_vm1, %v2127_v39 }
  0x6d   : > { %1805 = vmatmul.mubr.msk.f32.gmra.mxu1 %vm183_vm1, %v2091_v31  ;;  %1857 = vmatprep.mubr.msk.f32.mxu0 %vm183_vm1, %v2131_v41 }
  0x6e   : > { %1807 = vmatprep.mubr.msk.f32.mxu1 %vm183_vm1, %v2095_v33 }
  0x70   : > { %1858 = vmatmul.mubr.msk.f32.gmra.mxu0 %vm183_vm1, %v2155_v51 }
  0x71   : > { %1808 = vmatmul.mubr.msk.f32.gmra.mxu1 %vm183_vm1, %v2107_v35  ;;  %1860 = vmatprep.mubr.msk.f32.mxu0 %vm183_vm1, %v2159_v53 }
  0x72   : > { %1810 = vmatprep.mubr.msk.f32.mxu1 %vm183_vm1, %v2115_v37 }
  0x74   : > { %1861 = vmatmul.mubr.msk.f32.gmra.mxu0 %vm183_vm1, %v2167_v55 }
  0x75   : > { %1811 = vmatmul.mubr.msk.f32.gmra.mxu1 %vm183_vm1, %v2127_v39  ;;  %1863 = vmatprep.mubr.msk.f32.mxu0 %vm183_vm1, %v2169_v57 }
  0x76   : > { %1813 = vmatprep.mubr.msk.f32.mxu1 %vm183_vm1, %v2131_v41 }
  0x78   : > { %1864 = vmatmul.mubr.msk.f32.gmra.mxu0 %vm183_vm1, %v2177_v59 }
  0x79   : > { %1814 = vmatmul.mubr.msk.f32.gmra.mxu1 %vm183_vm1, %v2155_v51  ;;  %1866 = vmatprep.mubr.msk.f32.mxu0 %vm183_vm1, %v2179_v61 }
  0x7a   : > { %1816 = vmatprep.mubr.msk.f32.mxu1 %vm183_vm1, %v2159_v53 }
  0x7c   : > { %1867 = vmatmul.mubr.msk.f32.gmra.mxu0 %vm183_vm1, %v2187_v63 }
  0x7d   : > { %1817 = vmatmul.mubr.msk.f32.gmra.mxu1 %vm183_vm1, %v2167_v55  ;;  %1869 = vmatprep.mubr.msk.f32.mxu0 %vm183_vm1, %v2189_v1 }
  0x7e   : > { %1819 = vmatprep.mubr.msk.f32.mxu1 %vm183_vm1, %v2169_v57 }
  0x80   : > { %1870 = vmatmul.mubr.msk.f32.gmra.mxu0 %vm183_vm1, %v2197_v3 }
  0x81   : > { %1820 = vmatmul.mubr.msk.f32.gmra.mxu1 %vm183_vm1, %v2177_v59  ;;  %1872 = vmatprep.mubr.msk.f32.mxu0 %vm183_vm1, %v1032_v6 }
  0x82   : > { %1822 = vmatprep.mubr.msk.f32.mxu1 %vm183_vm1, %v2179_v61 }
  0x84   : > { %1873 = vmatmul.mubr.msk.f32.gmra.mxu0 %vm183_vm1, %v1033_v7 }
  0x85   : > { %1823 = vmatmul.mubr.msk.f32.gmra.mxu1 %vm183_vm1, %v2187_v63 }
  0xe8   : > { %v1729_v8 = vpop.f32.mrf.mxu0 }
  0xe9   : > { %v2308_v9 = vpop.f32.mrf.mxu1 }
  0xea   : > { %v518_v10 = vpop.f32.mrf.mxu0 }
  0xeb   : > { %v2310_v11 = vpop.f32.mrf.mxu1 }
  0xec   : > { %v1732_v12 = vpop.f32.mrf.mxu0 }
  0xed   : > { %v2312_v13 = vpop.f32.mrf.mxu1 }
  0xee   : > { %v528_v14 = vpop.f32.mrf.mxu0 }
  0xef   : > { %v2314_v15 = vpop.f32.mrf.mxu1 }
  0xf0   : > { %v1735_v16 = vpop.f32.mrf.mxu0 }
  0xf1   : > { %v2316_v17 = vpop.f32.mrf.mxu1 }
  0xf2   : > { %v538_v18 = vpop.f32.mrf.mxu0 }
  0xf3   : > { %v2318_v19 = vpop.f32.mrf.mxu1 }
  0xf4   : > { %v1738_v20 = vpop.f32.mrf.mxu0 }
  0xf5   : > { %v2320_v21 = vpop.f32.mrf.mxu1 }
  0xf6   : > { %v548_v22 = vpop.f32.mrf.mxu0 }
  0xf7   : > { %v2322_v23 = vpop.f32.mrf.mxu1 }
  0xf8   : > { %v1741_v24 = vpop.f32.mrf.mxu0 }
  0xf9   : > { %v2324_v25 = vpop.f32.mrf.mxu1 }
  0xfa   : > { %v558_v26 = vpop.f32.mrf.mxu0 }
  0xfb   : > { %v2326_v27 = vpop.f32.mrf.mxu1 }
  0xfc   : > { %v2328_v28 = vpop.f32.mrf.mxu0 }
  0xfd   : > { %v2330_v29 = vpop.f32.mrf.mxu1 }
  0xfe   : > { %v2332_v30 = vpop.f32.mrf.mxu0 }
  0xff   : > { %v2334_v31 = vpop.f32.mrf.mxu1 }
 0x100   : > { %v2336_v32 = vpop.f32.mrf.mxu0 }
 0x101   : > { %v2338_v33 = vpop.f32.mrf.mxu1 }
 0x102   : > { %v2340_v34 = vpop.f32.mrf.mxu0 }
 0x103   : > { %v2342_v35 = vpop.f32.mrf.mxu1 }
 0x104   : > { %v2344_v36 = vpop.f32.mrf.mxu0 }
 0x105   : > { %v2346_v37 = vpop.f32.mrf.mxu1 }
 0x106   : > { %v2348_v38 = vpop.f32.mrf.mxu0 }
 0x107   : > { %v2350_v39 = vpop.f32.mrf.mxu1 }
 0x108   : > { %v1829_v41 = vpop.f32.mrf.mxu0 }
 0x109   : > { %v1779_v40 = vpop.f32.mrf.mxu1 }
 0x10a   : > { %v848_v42 = vadd.f32 %v1779_v40, %v1729_v8  ;;  %v1201_v44 = vpop.f32.mrf.mxu0 }
 0x10b   : > { %v842_v43 = vpop.f32.mrf.mxu1 }
 0x10c   : > { %v1361_v45 = vadd.f32 %v1829_v41, %v848_v42  ;;  %v843_v46 = vadd.f32 %v842_v43, %v518_v10  ;;  %v1832_v48 = vpop.f32.mrf.mxu0 }
 0x10d   : > { %v1782_v47 = vpop.f32.mrf.mxu1 }
 0x10e   : > { %1394 = vst.msk [vmem:[%s2357_s25 + $0x8] sm:$0xff] %vm1392_vm2, %v1361_v45  ;;  %v1360_v49 = vadd.f32 %v1201_v44, %v843_v46  ;;  %v858_v50 = vadd.f32 %v1782_v47, %v1732_v12  ;;  %v1211_v52 = vpop.f32.mrf.mxu0 }
 0x10f   : > { %v852_v51 = vpop.f32.mrf.mxu1 }
 0x110   : > { %1393 = vst.msk [vmem:[%s2357_s25] sm:$0xff] %vm1392_vm2, %v1360_v49  ;;  %v1363_v53 = vadd.f32 %v1832_v48, %v858_v50  ;;  %v853_v54 = vadd.f32 %v852_v51, %v528_v14  ;;  %v1835_v56 = vpop.f32.mrf.mxu0 }
 0x111   : > { %v1785_v55 = vpop.f32.mrf.mxu1 }
 0x112   : > { %1396 = vst.msk [vmem:[%s2357_s25 + $0x18] sm:$0xff] %vm1392_vm2, %v1363_v53  ;;  %v1362_v57 = vadd.f32 %v1211_v52, %v853_v54  ;;  %v868_v58 = vadd.f32 %v1785_v55, %v1735_v16  ;;  %v1221_v60 = vpop.f32.mrf.mxu0 }
 0x113   : > { %v862_v59 = vpop.f32.mrf.mxu1 }
 0x114   : > { %1395 = vst.msk [vmem:[%s2357_s25 + $0x10] sm:$0xff] %vm1392_vm2, %v1362_v57  ;;  %v1365_v61 = vadd.f32 %v1835_v56, %v868_v58  ;;  %v863_v62 = vadd.f32 %v862_v59, %v538_v18  ;;  %v1838_v0 = vpop.f32.mrf.mxu0 }
 0x115   : > { %v1788_v63 = vpop.f32.mrf.mxu1 }
 0x116   : > { %1398 = vst.msk [vmem:[%s2357_s25 + $0x28] sm:$0xff] %vm1392_vm2, %v1365_v61  ;;  %v1364_v1 = vadd.f32 %v1221_v60, %v863_v62  ;;  %v878_v2 = vadd.f32 %v1788_v63, %v1738_v20  ;;  %v1231_v4 = vpop.f32.mrf.mxu0 }
 0x117   : > { %v872_v3 = vpop.f32.mrf.mxu1 }
 0x118   : > { %1397 = vst.msk [vmem:[%s2357_s25 + $0x20] sm:$0xff] %vm1392_vm2, %v1364_v1  ;;  %v1367_v5 = vadd.f32 %v1838_v0, %v878_v2  ;;  %v873_v6 = vadd.f32 %v872_v3, %v548_v22  ;;  %v1841_v8 = vpop.f32.mrf.mxu0 }
 0x119   : > { %v1791_v7 = vpop.f32.mrf.mxu1 }
 0x11a   : > { %1400 = vst.msk [vmem:[%s2357_s25 + $0x38] sm:$0xff] %vm1392_vm2, %v1367_v5  ;;  %v1366_v10 = vadd.f32 %v1231_v4, %v873_v6  ;;  %v888_v12 = vadd.f32 %v1791_v7, %v1741_v24  ;;  %v1241_v16 = vpop.f32.mrf.mxu0 }
 0x11b   : > { %v882_v14 = vpop.f32.mrf.mxu1 }
 0x11c   : > { %1399 = vst.msk [vmem:[%s2357_s25 + $0x30] sm:$0xff] %vm1392_vm2, %v1366_v10  ;;  %v1369_v18 = vadd.f32 %v1841_v8, %v888_v12  ;;  %v883_v20 = vadd.f32 %v882_v14, %v558_v26  ;;  %v1844_v41 = vpop.f32.mrf.mxu0 }
 0x11d   : > { %v1794_v40 = vpop.f32.mrf.mxu1 }
 0x11e   : > { %1402 = vst.msk [vmem:[%s2357_s25 + $0x48] sm:$0xff] %vm1392_vm2, %v1369_v18  ;;  %v1368_v22 = vadd.f32 %v1241_v16, %v883_v20  ;;  %v898_v42 = vadd.f32 %v1794_v40, %v2328_v28  ;;  %v1251_v44 = vpop.f32.mrf.mxu0 }
 0x11f   : > { %v892_v43 = vpop.f32.mrf.mxu1 }
 0x120   : > { %1401 = vst.msk [vmem:[%s2357_s25 + $0x40] sm:$0xff] %vm1392_vm2, %v1368_v22  ;;  %v1371_v24 = vadd.f32 %v1844_v41, %v898_v42  ;;  %v893_v45 = vadd.f32 %v892_v43, %v2332_v30  ;;  %v1847_v47 = vpop.f32.mrf.mxu0 }
 0x121   : > { %v1797_v46 = vpop.f32.mrf.mxu1 }
 0x122   : > { %1404 = vst.msk [vmem:[%s2357_s25 + $0x58] sm:$0xff] %vm1392_vm2, %v1371_v24  ;;  %v1370_v26 = vadd.f32 %v1251_v44, %v893_v45  ;;  %v908_v48 = vadd.f32 %v1797_v46, %v2336_v32  ;;  %v1261_v50 = vpop.f32.mrf.mxu0 }
 0x123   : > { %v902_v49 = vpop.f32.mrf.mxu1 }
 0x124   : > { %1403 = vst.msk [vmem:[%s2357_s25 + $0x50] sm:$0xff] %vm1392_vm2, %v1370_v26  ;;  %v1373_v28 = vadd.f32 %v1847_v47, %v908_v48  ;;  %v903_v51 = vadd.f32 %v902_v49, %v2340_v34  ;;  %v1850_v53 = vpop.f32.mrf.mxu0 }
 0x125   : > { %v1800_v52 = vpop.f32.mrf.mxu1 }
 0x126   : > { %1406 = vst.msk [vmem:[%s2357_s25 + $0x68] sm:$0xff] %vm1392_vm2, %v1373_v28  ;;  %v1372_v30 = vadd.f32 %v1261_v50, %v903_v51  ;;  %v918_v54 = vadd.f32 %v1800_v52, %v2344_v36  ;;  %v1271_v56 = vpop.f32.mrf.mxu0 }
 0x127   : > { %v912_v55 = vpop.f32.mrf.mxu1 }
 0x128   : > { %1405 = vst.msk [vmem:[%s2357_s25 + $0x60] sm:$0xff] %vm1392_vm2, %v1372_v30  ;;  %v1375_v32 = vadd.f32 %v1850_v53, %v918_v54  ;;  %v913_v57 = vadd.f32 %v912_v55, %v2348_v38  ;;  %v1853_v59 = vpop.f32.mrf.mxu0 }
 0x129   : > { %v1803_v58 = vpop.f32.mrf.mxu1 }
 0x12a   : > { %1408 = vst.msk [vmem:[%s2357_s25 + $0x78] sm:$0xff] %vm1392_vm2, %v1375_v32  ;;  %v1374_v34 = vadd.f32 %v1271_v56, %v913_v57  ;;  %v928_v60 = vadd.f32 %v1803_v58, %v2308_v9  ;;  %v1281_v62 = vpop.f32.mrf.mxu0 }
 0x12b   : > { %v922_v61 = vpop.f32.mrf.mxu1 }
 0x12c   : > { %1407 = vst.msk [vmem:[%s2357_s25 + $0x70] sm:$0xff] %vm1392_vm2, %v1374_v34  ;;  %v1377_v36 = vadd.f32 %v1853_v59, %v928_v60  ;;  %v923_v63 = vadd.f32 %v922_v61, %v2310_v11  ;;  %v1856_v1 = vpop.f32.mrf.mxu0 }
 0x12d   : > { %v1806_v0 = vpop.f32.mrf.mxu1 }
 0x12e   : > { %1410 = vst.msk [vmem:[%s2357_s25 + $0x88] sm:$0xff] %vm1392_vm2, %v1377_v36  ;;  %v1376_v38 = vadd.f32 %v1281_v62, %v923_v63  ;;  %v938_v2 = vadd.f32 %v1806_v0, %v2312_v13  ;;  %v1291_v4 = vpop.f32.mrf.mxu0 }
 0x12f   : > { %v932_v3 = vpop.f32.mrf.mxu1 }
 0x130   : > { %1409 = vst.msk [vmem:[%s2357_s25 + $0x80] sm:$0xff] %vm1392_vm2, %v1376_v38  ;;  %v1379_v9 = vadd.f32 %v1856_v1, %v938_v2  ;;  %v933_v5 = vadd.f32 %v932_v3, %v2314_v15  ;;  %v1859_v7 = vpop.f32.mrf.mxu0 }
 0x131   : > { %v1809_v6 = vpop.f32.mrf.mxu1 }
 0x132   : > { %1412 = vst.msk [vmem:[%s2357_s25 + $0x98] sm:$0xff] %vm1392_vm2, %v1379_v9  ;;  %v1378_v11 = vadd.f32 %v1291_v4, %v933_v5  ;;  %v948_v8 = vadd.f32 %v1809_v6, %v2316_v17  ;;  %v1301_v12 = vpop.f32.mrf.mxu0 }
 0x133   : > { %v942_v10 = vpop.f32.mrf.mxu1 }
 0x134   : > { %1411 = vst.msk [vmem:[%s2357_s25 + $0x90] sm:$0xff] %vm1392_vm2, %v1378_v11  ;;  %v1381_v13 = vadd.f32 %v1859_v7, %v948_v8  ;;  %v943_v14 = vadd.f32 %v942_v10, %v2318_v19  ;;  %v1862_v18 = vpop.f32.mrf.mxu0 }
 0x135   : > { %v1812_v16 = vpop.f32.mrf.mxu1 }
 0x136   : > { %1414 = vst.msk [vmem:[%s2357_s25 + $0xa8] sm:$0xff] %vm1392_vm2, %v1381_v13  ;;  %v1380_v15 = vadd.f32 %v1301_v12, %v943_v14  ;;  %v958_v20 = vadd.f32 %v1812_v16, %v2320_v21  ;;  %v1311_v41 = vpop.f32.mrf.mxu0 }
 0x137   : > { %v952_v40 = vpop.f32.mrf.mxu1 }
 0x138   : > { %1413 = vst.msk [vmem:[%s2357_s25 + $0xa0] sm:$0xff] %vm1392_vm2, %v1380_v15  ;;  %v1383_v17 = vadd.f32 %v1862_v18, %v958_v20  ;;  %v953_v22 = vadd.f32 %v952_v40, %v2322_v23  ;;  %v1865_v43 = vpop.f32.mrf.mxu0 }
 0x139   : > { %v1815_v42 = vpop.f32.mrf.mxu1 }
 0x13a   : > { %1416 = vst.msk [vmem:[%s2357_s25 + $0xb8] sm:$0xff] %vm1392_vm2, %v1383_v17  ;;  %v1382_v19 = vadd.f32 %v1311_v41, %v953_v22  ;;  %v968_v44 = vadd.f32 %v1815_v42, %v2324_v25  ;;  %v1321_v45 = vpop.f32.mrf.mxu0 }
 0x13b   : > { %v962_v24 = vpop.f32.mrf.mxu1 }
 0x13c   : > { %1415 = vst.msk [vmem:[%s2357_s25 + $0xb0] sm:$0xff] %vm1392_vm2, %v1382_v19  ;;  %v1385_v21 = vadd.f32 %v1865_v43, %v968_v44  ;;  %v963_v46 = vadd.f32 %v962_v24, %v2326_v27  ;;  %v1868_v26 = vpop.f32.mrf.mxu0 }
 0x13d   : > { %v1818_v47 = vpop.f32.mrf.mxu1 }
 0x13e   : > { %1418 = vst.msk [vmem:[%s2357_s25 + $0xc8] sm:$0xff] %vm1392_vm2, %v1385_v21  ;;  %v1384_v23 = vadd.f32 %v1321_v45, %v963_v46  ;;  %v978_v48 = vadd.f32 %v1818_v47, %v2330_v29  ;;  %v1331_v50 = vpop.f32.mrf.mxu0 }
 0x13f   : > { %v972_v49 = vpop.f32.mrf.mxu1 }
 0x140   : > { %1417 = vst.msk [vmem:[%s2357_s25 + $0xc0] sm:$0xff] %vm1392_vm2, %v1384_v23  ;;  %v1387_v25 = vadd.f32 %v1868_v26, %v978_v48  ;;  %v973_v28 = vadd.f32 %v972_v49, %v2334_v31  ;;  %v1871_v52 = vpop.f32.mrf.mxu0 }
 0x141   : > { %v1821_v51 = vpop.f32.mrf.mxu1 }
 0x142   : > { %1420 = vst.msk [vmem:[%s2357_s25 + $0xd8] sm:$0xff] %vm1392_vm2, %v1387_v25  ;;  %v1386_v27 = vadd.f32 %v1331_v50, %v973_v28  ;;  %v988_v53 = vadd.f32 %v1821_v51, %v2338_v33  ;;  %v1341_v54 = vpop.f32.mrf.mxu0 }
 0x143   : > { %v982_v30 = vpop.f32.mrf.mxu1 }
 0x144   : > { %1419 = vst.msk [vmem:[%s2357_s25 + $0xd0] sm:$0xff] %vm1392_vm2, %v1386_v27  ;;  %v1389_v29 = vadd.f32 %v1871_v52, %v988_v53  ;;  %v983_v55 = vadd.f32 %v982_v30, %v2342_v35  ;;  %v1874_v32 = vpop.f32.mrf.mxu0 }
 0x145   : > { %v1824_v56 = vpop.f32.mrf.mxu1 }
 0x146   : > { %1422 = vst.msk [vmem:[%s2357_s25 + $0xe8] sm:$0xff] %vm1392_vm2, %v1389_v29  ;;  %v1388_v31 = vadd.f32 %v1341_v54, %v983_v55  ;;  %v998_v57 = vadd.f32 %v1824_v56, %v2346_v37  ;;  %v1351_v34 = vpop.f32.mrf.mxu0 }
 0x147   : > { %v992_v58 = vpop.f32.mrf.mxu1 }
 0x148   : > { %1421 = vst.msk [vmem:[%s2357_s25 + $0xe0] sm:$0xff] %vm1392_vm2, %v1388_v31  ;;  %v1391_v33 = vadd.f32 %v1874_v32, %v998_v57  ;;  %v993_v59 = vadd.f32 %v992_v58, %v2350_v39 }
 0x14a   : > { %1424 = vst.msk [vmem:[%s2357_s25 + $0xf8] sm:$0xff] %vm1392_vm2, %v1391_v33  ;;  %v1390_v60 = vadd.f32 %v1351_v34, %v993_v59 }
 0x14c   : > { %1423 = vst.msk [vmem:[%s2357_s25 + $0xf0] sm:$0xff] %vm1392_vm2, %v1390_v60 }
 0x14d PF: > { %s12_s11 = sadd.s32 1, %s1924_s11   ;;  %s2457_s9 = smov %s1920_s10 }
 0x14e   : > { %p9_p5 = scmp.ge.s32.totalorder %s12_s11, 4   ;;  %s2458_s10 = smov %s2460_s12 }
 0x150   :  { %11 = sbr.rel (!%p9_p5) target bundleno = 2 (0x2), region = 62 }

</bundles_post_ra>
